<compile_context>
chip_gen: v7x
topology: tpu7x:2x2x1
jax: 0.10.0
libtpu: 0.0.40
codegen_flags: <defaults>
</compile_context>

<pallas_src>
import functools

import jax
import jax.numpy as jnp
from jax.experimental import pallas as pl
from jax.experimental.pallas import tpu as pltpu


def _ms_self_cam_kernel(chp_ref, gb_ref, x_ref, o_ref, *, eps, inv_f):
    """One grid step processes a (C, T_blk, F) slab.

    chp_ref: (C, 5) per-channel params [w_l1, w_l1^2, w_l2, c0, a_l],
             where c0 = (constant global-branch output) + b_l2.
    gb_ref:  (2, F)  LayerNorm(F) affine [gamma_l ; beta_l].
    """
    x = x_ref[...].astype(jnp.float32)                       # (C, T_blk, F)

    chp = chp_ref[...]                                       # (C, 5)
    w1  = chp[:, 0:1][..., None]                             # (C, 1, 1)
    w1s = chp[:, 1:2][..., None]                             # w_l1^2
    w2  = chp[:, 2:3][..., None]
    c0  = chp[:, 3:4][..., None]
    a_l = chp[:, 4:5][..., None]

    gb = gb_ref[...]                                         # (2, F)
    gamma_l = gb[0:1, :][None, :, :]                         # (1, 1, F)
    beta_l  = gb[1:2, :][None, :, :]

    # local branch: dwConv -> LayerNorm(F) -> PReLU -> dwConv, with the conv
    # affine folded into the LN statistics (single pass over x; b_l1 cancels).
    mean_x = jnp.sum(x, axis=-1, keepdims=True) * inv_f      # E[x]   (C,T,1)
    ex2    = jnp.sum(x * x, axis=-1, keepdims=True) * inv_f  # E[x^2]
    var_x  = ex2 - mean_x * mean_x                           # Var[x]
    inv_std = jax.lax.rsqrt(w1s * var_x + eps)               # 1/sqrt(var(l1)+eps)
    lnorm = (w1 * (x - mean_x)) * inv_std                    # LN-normalized l1
    lln = gamma_l * lnorm + beta_l
    lp = jnp.where(lln >= 0.0, lln, a_l * lln)               # PReLU (1 param)
    x_ = w2 * lp + c0                                        # conv2 + global const

    o_ref[...] = (x * jax.nn.sigmoid(x_)).astype(o_ref.dtype)


def _choose_t_block(C, T, F, itemsize, budget_bytes=16 * 1024 * 1024):
    """Largest T tile whose double-buffered in+out blocks fit the budget."""
    per_row = 4 * C * F * itemsize            # 2 buffers x (in + out)
    t_blk = max(1, budget_bytes // per_row)
    if t_blk >= T:
        return T
    return max(8, (t_blk // 8) * 8)           # keep sublane-aligned


def ms_self_cam(x, p):
    B, C, T, F = x.shape
    f32 = jnp.float32

    # ---- fold the (data-independent) global branch into per-channel consts.
    beta_g = jnp.asarray(p["beta_g"], f32)
    a_g = jnp.asarray(p["a_g"], f32)
    prelu_g = jnp.where(beta_g >= 0.0, beta_g, a_g * beta_g)          # scalar
    g2 = p["w_g2"].astype(f32) * prelu_g + p["b_g2"].astype(f32)      # (C,)
    c0 = g2 + p["b_l2"].astype(f32)                                   # (C,)

    w_l1 = p["w_l1"].astype(f32)
    a_l = jnp.broadcast_to(jnp.asarray(p["a_l"], f32), (C,))
    chp = jnp.stack([w_l1, w_l1 * w_l1, p["w_l2"].astype(f32), c0, a_l],
                    axis=-1)                                          # (C, 5)
    gb = jnp.stack([p["gamma_l"].astype(f32),
                    p["beta_l"].astype(f32)], axis=0)                 # (2, F)

    eps = float(p["eps"])          # static hyper-parameter (== inp_channels)
    t_blk = _choose_t_block(C, T, F, x.dtype.itemsize)
    grid = (B, pl.cdiv(T, t_blk))

    kernel = functools.partial(_ms_self_cam_kernel, eps=eps, inv_f=1.0 / F)

    return pl.pallas_call(
        kernel,
        out_shape=jax.ShapeDtypeStruct(x.shape, x.dtype),
        grid=grid,
        in_specs=[
            pl.BlockSpec((C, 5), lambda b, t: (0, 0)),     # per-channel params
            pl.BlockSpec((2, F), lambda b, t: (0, 0)),     # gamma_l / beta_l
            pl.BlockSpec((None, C, t_blk, F), lambda b, t: (b, 0, t, 0)),
        ],
        out_specs=pl.BlockSpec((None, C, t_blk, F), lambda b, t: (b, 0, t, 0)),
        compiler_params=pltpu.CompilerParams(
            dimension_semantics=("parallel", "parallel"),
            vmem_limit_bytes=32 * 1024 * 1024,
        ),
    )(chp, gb, x)


def ms_self_cam_ref(x, p):
    """Pure-JAX reference mirroring the PyTorch forward exactly."""
    eps = p["eps"]
    bc = lambda v: v[None, :, None, None]
    # global branch
    g = jnp.mean(x, axis=-1, keepdims=True)                       # AvgPool2d((1,F))
    g = bc(p["w_g1"]) * g + bc(p["b_g1"])                         # dw 1x1 conv
    g = (g - g) / jnp.sqrt(jnp.zeros_like(g) + eps)               # LayerNorm(1)
    g = p["gamma_g"] * g + p["beta_g"]
    g = jnp.where(g >= 0, g, p["a_g"] * g)                        # PReLU
    g = bc(p["w_g2"]) * g + bc(p["b_g2"])                         # dw 1x1 conv
    # local branch
    l = bc(p["w_l1"]) * x + bc(p["b_l1"])                         # dw 1x1 conv
    mean = jnp.mean(l, axis=-1, keepdims=True)
    var = jnp.mean((l - mean) ** 2, axis=-1, keepdims=True)
    l = (l - mean) / jnp.sqrt(var + eps)                          # LayerNorm(F)
    l = p["gamma_l"] * l + p["beta_l"]
    l = jnp.where(l >= 0, l, p["a_l"] * l)                        # PReLU
    l = bc(p["w_l2"]) * l + bc(p["b_l2"])                         # dw 1x1 conv
    return x * jax.nn.sigmoid(g + l)


def make_params(key, C, F):
    ks = jax.random.split(key, 12)
    u = lambda k, shape: jax.random.uniform(k, shape, jnp.float32, -0.5, 0.5)
    return {
        # layer_global: conv1 (w,b), LN(1) (gamma,beta), PReLU a, conv2 (w,b)
        "w_g1": u(ks[0], (C,)), "b_g1": u(ks[1], (C,)),
        "gamma_g": 1.2, "beta_g": 0.1, "a_g": 0.25,
        "w_g2": u(ks[2], (C,)), "b_g2": u(ks[3], (C,)),
        # layer_local: conv1 (w,b), LN(F) (gamma,beta), PReLU a, conv2 (w,b)
        "w_l1": u(ks[4], (C,)), "b_l1": u(ks[5], (C,)),
        "gamma_l": u(ks[6], (F,)) + 1.0, "beta_l": u(ks[7], (F,)),
        "a_l": 0.25,
        "w_l2": u(ks[8], (C,)), "b_l2": u(ks[9], (C,)),
        # NOTE: torch code passes inp_channels as the LayerNorm *eps* argument.
        "eps": float(C),
    }


if __name__ == "__main__":
    B, C, T, F = 2, 4, 16, 16
    key = jax.random.PRNGKey(0)
    kx, kp = jax.random.split(key)
    x = jax.random.normal(kx, (B, C, T, F), dtype=jnp.float32)
    params = make_params(kp, C, F)

    out = jax.block_until_ready(ms_self_cam(x, params))
    ref = jax.block_until_ready(ms_self_cam_ref(x, params))

    assert out.shape == x.shape and out.dtype == x.dtype
    assert jnp.allclose(out, ref, atol=1e-5, rtol=1e-5), "mismatch vs reference"
    print("KERNEL_OK")
</pallas_src>

<mosaic_0001>
module attributes {stable_mosaic.version = 11 : i64} {
  func.func @_ms_self_cam_kernel(%arg0: i32, %arg1: i32, %arg2: memref<4x5xf32, #tpu.memory_space<vmem>>, %arg3: memref<2x16xf32, #tpu.memory_space<vmem>>, %arg4: memref<1x4x16x16xf32, #tpu.memory_space<vmem>>, %arg5: memref<1x4x16x16xf32, #tpu.memory_space<vmem>>) attributes {dimension_semantics = [#tpu.dimension_semantics<parallel>, #tpu.dimension_semantics<parallel>], iteration_bounds = array<i64: 2, 1>, scalar_prefetch = 0 : i64, scratch_operands = 0 : i64, tpu.core_type = #tpu.core_type<tc>, window_params = [{pipeline_mode = #tpu.pipeline_mode<synchronous>, transform_indices = @transform_0, window_bounds = array<i64: 4, 5>}, {pipeline_mode = #tpu.pipeline_mode<synchronous>, transform_indices = @transform_1, window_bounds = array<i64: 2, 16>}, {transform_indices = @transform_2, window_bounds = array<i64: 1, 4, 16, 16>}, {transform_indices = @transform_3, window_bounds = array<i64: 1, 4, 16, 16>}]} {
    %c0 = arith.constant 0 : index
    %c0_0 = arith.constant 0 : index
    %c0_1 = arith.constant 0 : index
    %c0_2 = arith.constant 0 : index
    %0 = vector.load %arg4[%c0, %c0_0, %c0_1, %c0_2] : memref<1x4x16x16xf32, #tpu.memory_space<vmem>>, vector<1x4x16x16xf32>
    %1 = vector.shape_cast %0 : vector<1x4x16x16xf32> to vector<4x16x16xf32>
    %c0_3 = arith.constant 0 : index
    %c0_4 = arith.constant 0 : index
    %2 = vector.load %arg2[%c0_3, %c0_4] : memref<4x5xf32, #tpu.memory_space<vmem>>, vector<4x5xf32>
    %3 = vector.extract_strided_slice %2 {offsets = [0, 0], sizes = [4, 1], strides = [1, 1]} : vector<4x5xf32> to vector<4x1xf32>
    %4 = vector.shape_cast %3 : vector<4x1xf32> to vector<4x1x1xf32>
    %5 = vector.extract_strided_slice %2 {offsets = [0, 1], sizes = [4, 1], strides = [1, 1]} : vector<4x5xf32> to vector<4x1xf32>
    %6 = vector.shape_cast %5 : vector<4x1xf32> to vector<4x1x1xf32>
    %7 = vector.extract_strided_slice %2 {offsets = [0, 2], sizes = [4, 1], strides = [1, 1]} : vector<4x5xf32> to vector<4x1xf32>
    %8 = vector.shape_cast %7 : vector<4x1xf32> to vector<4x1x1xf32>
    %9 = vector.extract_strided_slice %2 {offsets = [0, 3], sizes = [4, 1], strides = [1, 1]} : vector<4x5xf32> to vector<4x1xf32>
    %10 = vector.shape_cast %9 : vector<4x1xf32> to vector<4x1x1xf32>
    %11 = vector.extract_strided_slice %2 {offsets = [0, 4], sizes = [4, 1], strides = [1, 1]} : vector<4x5xf32> to vector<4x1xf32>
    %12 = vector.shape_cast %11 : vector<4x1xf32> to vector<4x1x1xf32>
    %c0_5 = arith.constant 0 : index
    %c0_6 = arith.constant 0 : index
    %13 = vector.load %arg3[%c0_5, %c0_6] : memref<2x16xf32, #tpu.memory_space<vmem>>, vector<2x16xf32>
    %14 = vector.extract_strided_slice %13 {offsets = [0, 0], sizes = [1, 16], strides = [1, 1]} : vector<2x16xf32> to vector<1x16xf32>
    %15 = vector.shape_cast %14 : vector<1x16xf32> to vector<1x1x16xf32>
    %16 = vector.extract_strided_slice %13 {offsets = [1, 0], sizes = [1, 16], strides = [1, 1]} : vector<2x16xf32> to vector<1x16xf32>
    %17 = vector.shape_cast %16 : vector<1x16xf32> to vector<1x1x16xf32>
    %cst = arith.constant dense<0.000000e+00> : vector<4x16xf32>
    %18 = vector.multi_reduction <add>, %1, %cst [2] : vector<4x16x16xf32> to vector<4x16xf32>
    %19 = vector.shape_cast %18 : vector<4x16xf32> to vector<4x16x1xf32>
    %cst_7 = arith.constant 6.250000e-02 : f32
    %20 = vector.broadcast %cst_7 : f32 to vector<4x16x1xf32>
    %21 = arith.mulf %19, %20 : vector<4x16x1xf32>
    %22 = arith.mulf %1, %1 : vector<4x16x16xf32>
    %cst_8 = arith.constant dense<0.000000e+00> : vector<4x16xf32>
    %23 = vector.multi_reduction <add>, %22, %cst_8 [2] : vector<4x16x16xf32> to vector<4x16xf32>
    %24 = vector.shape_cast %23 : vector<4x16xf32> to vector<4x16x1xf32>
    %cst_9 = arith.constant 6.250000e-02 : f32
    %25 = vector.broadcast %cst_9 : f32 to vector<4x16x1xf32>
    %26 = arith.mulf %24, %25 : vector<4x16x1xf32>
    %27 = arith.mulf %21, %21 : vector<4x16x1xf32>
    %28 = arith.subf %26, %27 : vector<4x16x1xf32>
    %29 = vector.broadcast %6 : vector<4x1x1xf32> to vector<4x16x1xf32>
    %30 = arith.mulf %29, %28 : vector<4x16x1xf32>
    %cst_10 = arith.constant 4.000000e+00 : f32
    %31 = vector.broadcast %cst_10 : f32 to vector<4x16x1xf32>
    %32 = arith.addf %30, %31 : vector<4x16x1xf32>
    %33 = math.rsqrt %32 : vector<4x16x1xf32>
    %34 = vector.broadcast %21 : vector<4x16x1xf32> to vector<4x16x16xf32>
    %35 = arith.subf %1, %34 : vector<4x16x16xf32>
    %36 = vector.broadcast %4 : vector<4x1x1xf32> to vector<4x16x16xf32>
    %37 = arith.mulf %36, %35 : vector<4x16x16xf32>
    %38 = vector.broadcast %33 : vector<4x16x1xf32> to vector<4x16x16xf32>
    %39 = arith.mulf %37, %38 : vector<4x16x16xf32>
    %40 = vector.broadcast %15 : vector<1x1x16xf32> to vector<4x16x16xf32>
    %41 = arith.mulf %40, %39 : vector<4x16x16xf32>
    %42 = vector.broadcast %17 : vector<1x1x16xf32> to vector<4x16x16xf32>
    %43 = arith.addf %41, %42 : vector<4x16x16xf32>
    %cst_11 = arith.constant 0.000000e+00 : f32
    %44 = vector.broadcast %cst_11 : f32 to vector<4x16x16xf32>
    %45 = arith.cmpf oge, %43, %44 : vector<4x16x16xf32>
    %46 = vector.broadcast %12 : vector<4x1x1xf32> to vector<4x16x16xf32>
    %47 = arith.mulf %46, %43 : vector<4x16x16xf32>
    %48 = arith.select %45, %43, %47 : vector<4x16x16xi1>, vector<4x16x16xf32>
    %49 = vector.broadcast %8 : vector<4x1x1xf32> to vector<4x16x16xf32>
    %50 = arith.mulf %49, %48 : vector<4x16x16xf32>
    %51 = vector.broadcast %10 : vector<4x1x1xf32> to vector<4x16x16xf32>
    %52 = arith.addf %50, %51 : vector<4x16x16xf32>
    %53 = arith.negf %52 : vector<4x16x16xf32>
    %54 = math.exp %53 : vector<4x16x16xf32>
    %cst_12 = arith.constant 1.000000e+00 : f32
    %55 = vector.broadcast %cst_12 : f32 to vector<4x16x16xf32>
    %56 = arith.addf %55, %54 : vector<4x16x16xf32>
    %57 = arith.divf %55, %56 : vector<4x16x16xf32>
    %58 = arith.mulf %1, %57 : vector<4x16x16xf32>
    %c0_13 = arith.constant 0 : index
    %c0_14 = arith.constant 0 : index
    %c0_15 = arith.constant 0 : index
    %c0_16 = arith.constant 0 : index
    %59 = vector.load %arg5[%c0_13, %c0_14, %c0_15, %c0_16] : memref<1x4x16x16xf32, #tpu.memory_space<vmem>>, vector<1x4x16x16xf32>
    %60 = vector.shape_cast %59 : vector<1x4x16x16xf32> to vector<4x16x16xf32>
    %61 = vector.shape_cast %58 : vector<4x16x16xf32> to vector<1x4x16x16xf32>
    tpu.vector_store %arg5[%c0_13, %c0_14, %c0_15, %c0_16], %61 {strides = array<i32>} : memref<1x4x16x16xf32, #tpu.memory_space<vmem>>, vector<1x4x16x16xf32>,
    return
  }
  func.func @transform_0(%arg0: i32, %arg1: i32) -> (i32, i32) {
    %c0_i32 = arith.constant 0 : i32
    %c0_i32_0 = arith.constant 0 : i32
    %c0_i32_1 = arith.constant 0 : i32
    return %c0_i32, %c0_i32_0 : i32, i32
  }
  func.func @transform_1(%arg0: i32, %arg1: i32) -> (i32, i32) {
    %c0_i32 = arith.constant 0 : i32
    %c0_i32_0 = arith.constant 0 : i32
    %c0_i32_1 = arith.constant 0 : i32
    return %c0_i32, %c0_i32_0 : i32, i32
  }
  func.func @transform_2(%arg0: i32, %arg1: i32) -> (i32, i32, i32, i32) {
    %c0_i32 = arith.constant 0 : i32
    %c0_i32_0 = arith.constant 0 : i32
    %c0_i32_1 = arith.constant 0 : i32
    return %arg0, %c0_i32, %arg1, %c0_i32_0 : i32, i32, i32, i32
  }
  func.func @transform_3(%arg0: i32, %arg1: i32) -> (i32, i32, i32, i32) {
    %c0_i32 = arith.constant 0 : i32
    %c0_i32_0 = arith.constant 0 : i32
    %c0_i32_1 = arith.constant 0 : i32
    return %arg0, %c0_i32, %arg1, %c0_i32_0 : i32, i32, i32, i32
  }
}

</mosaic_0001>

<bundles_post_ra>
// kernel: tpu_custom_call.1
= control target key start
LH: loop header
LB: loop body
LE: loop exit
PB: predicated region body
PF: predicated region fallthrough
CT: control target
= control target key end

     0   :  { %8 = vsyncpa [#allocation3], 0  ;;  %s1567_s0 = inlined_call_operand.hbm [shape: f32[4,5], index: 0, kind: input, shape index: {}]   ;;  %s1568_s1 = inlined_call_operand.vmem [shape: f32[2,16], index: 1, kind: input, shape index: {}]   ;;  %s1569_s2 = inlined_call_operand.hbm [shape: f32[2,4,16,16], index: 2, kind: input, shape index: {}]   ;;  %s1570_s3 = inlined_call_operand.hbm [shape: f32[2,4,16,16], index: 3, kind: output, shape index: {}]  }
   0x1   :  { %9 = vsyncpa [#allocation6], 0 }
   0x2   :  { %11 = vsyncpa [#allocation6 + $0x1], 0 }
   0x3   :  { %12 = vsyncpa [#allocation4], 0 }
   0x4   :  { %14 = vsyncpa [#allocation4 + $0x1], 0  ;;  %s1110_s12 = smov 0   ;;  %s1112_s13 = smov 0  }
   0x5   :  { %s1114_s14 = smov 0   ;;  %s1116_s15 = smov 0  }
   0x6   :  { %s1118_s16 = smov 0   ;;  %s1120_s17 = smov 0  }
   0x7 LB: > { %s761_s18 = sadd.s32 4294967295, %s1075_s17   ;;  %s762_s19 = sadd.s32 4294967294, %s1075_s17   ;;  %s1075_s17 = sphi %s1120_s17, %s20_s17   ;;  %s1071_s16 = sphi %s1118_s16, %s1598_s16   ;;  %s1067_s15 = sphi %s1116_s15, %s1597_s15   ;;  %s1063_s14 = sphi %s1114_s14, %s1596_s14   ;;  %s1059_s13 = sphi %s1112_s13, %s1595_s13   ;;  %s1055_s12 = sphi %s1110_s12, %s1594_s12  }
   0x8   : > { %s83_s20 = sadd.s32 1, %s1063_s14  ;;  %p90_p0 = scmp.ne.s32.totalorder %s1063_s14, %s1059_s13 }
   0x9   : > { %p91_p1 = scmp.eq.s32.totalorder %s1075_s17, 0  ;;  %p96_p2 = scmp.ne.s32.totalorder %s1059_s13, %s1055_s12 }
   0xa   : > { %p1148_p3 = scmp.eq.s32.totalorder %s761_s18, 0  ;;  %p122_p4 = scmp.eq.s32.totalorder %s761_s18, 1 }
   0xb   : > { %p1152_p5 = por %p91_p1, %p90_p0  ;;  %p128_p6 = scmp.eq.s32.totalorder %s762_s19, 1 }
   0xc   : > { %s1577_s21 = scalar_select %p1148_p3, 1, 0 }
   0xd   : > { %p1158_p7 = por %p1148_p3, %p96_p2  ;;  %p1162_p8 = por %p122_p4, %p90_p0 }
   0xe   : > { %p1166_p9 = por %p128_p6, %p96_p2  ;;  %p763_p10 = scmp.ge.s32.totalorder %s1075_s17, 1 }
   0xf   : > { %s1579_s23 = scalar_select %p1158_p7, 1, 0 }
  0x10   : > { %s1580_s24 = scalar_select %p1162_p8, 1, 0 }
  0x11   : > { %s1581_s25 = scalar_select %p1166_p9, 1, 0 }
  0x12   : > { %p135_p11 = scmp.lt.s32.totalorder %s1075_s17, 3  ;;  %s1077_s27 = smov [#allocation2]  }
  0x13   : > { %s148_s28 = sshll.u32 %s1077_s27, 4  ;;  %p810_p1 = scmp.lt.s32.totalorder %s1075_s17, 2  ;;  %s149_s28 = int_to_ptr.vmem [resolvable:$true] %s148_s28 }
  0x14   : > { %p1173_p13 = pnand %p763_p10, %p135_p11  ;;  %s32_s4 = sadd.s32 1, %s1071_s16 }
  0x15   : > { %p1182_p4 = pnand %p810_p1, %p1152_p5  ;;  %p1193_p6 = scmp.ge.s32.totalorder %s32_s4, 2 }
  0x16   : > { %s1582_s26 = scalar_select %p1173_p13, 1, 0 }
  0x17   : > { %p797_p0 = pneg %p1173_p13  ;;  %s162_s6 = sand.u32 1, %s1063_s14  }
  0x18   : > { %s1583_s29 = scalar_select %p1182_p4, 1, 0 }
  0x19   : > { %p1188_p2 = pnand %p797_p0, %p1148_p3  ;;  %s931_s9 = scalar_lea.hbm %s1567_s0, 64 }
  0x1a   : > { %s1585_s5 = scalar_select %p1193_p6, 1, 0 }
  0x1b   : > { %p932_p5 = scmp.ne.s32.totalorder %s1567_s0, %s931_s9  ;;  %p933_p10 = pneg %p1188_p2 }
  0x1c   : > { %p938_p0 = scmp.lt.u32.totalorder %s931_s9, %s1567_s0 }
  0x1d   : > { %p934_p11 = pnand %p933_p10, %p932_p5 }
  0x1f   : > { %p935_p1 = pneg %p934_p11 }
  0x21   : > { %p940_p12 = pnand %p938_p0, %p935_p1 }
  0x23   : > { %943 = shalt.err (!%p940_p12)
}
  0x24   : > { %s944_s22 = scalar_lea.vmem %s149_s28, 64  ;;  %p952_p3 = scmp.lt.s32.totalorder %s149_s28, %s149_s28 }
  0x25   : > { %p945_p9 = scmp.ne.s32.totalorder %s149_s28, %s944_s22  ;;  %p953_p13 = scmp.lt.s32.totalorder %s944_s22, %s944_s22 }
  0x27   : > { %p947_p8 = pnand %p945_p9, %p933_p10  ;;  %p954_p4 = por %p953_p13, %p952_p3 }
  0x29   : > { %p948_p7 = pneg %p947_p8 }
  0x2b   : > { %p955_p6 = pnand %p954_p4, %p948_p7 }
  0x2d   : > { %958 = shalt.err (!%p955_p6)
}
  0x2e   : > { %800 = dma.hbm_to_vmem [thread:$0]  (!%p1188_p2), %s1567_s0, 64, %s149_s28, [#allocation3]  }
  0x2f   : > { %p1586_p9 = scmp.ne.s32.totalorder %s1585_s5, 0  ;;  %s766_s8 = sshll.u32 %s162_s6, 6 }
  0x30   : > { %s787_s10 = sshll.u32 %s1071_s16, 10  ;;  %s166_s19 = scalar_lea.vmem [#allocation5], %s766_s8 }
  0x31   : > { %s1600_s4 = smov (%p1586_p9, %s32_s4), 0  ;;  %s1224_s18 = scalar_lea.hbm %s1569_s2, %s787_s10 }
  0x32   : > { %s78_s9 = ssub.s32 %s1071_s16, %s1600_s4  ;;  %s175_s22 = sshll.u32 %s166_s19, 4  ;;  %s1231_s22 = int_to_ptr.vmem [resolvable:$true] %s175_s22 }
  0x33   : > { %p81_p3 = scmp.eq.s32.totalorder %s78_s9, 0  ;;  %s1233_s5 = scalar_lea.sflag [#allocation6], %s162_s6 }
  0x34   : > { %s959_s27 = scalar_lea.hbm %s1224_s18, 1024  ;;  %p1587_p8 = scmp.ne.s32.totalorder %s1583_s29, 0 }
  0x35   : > { %s1229_s28 = scalar_select %p81_p3, %s1063_s14, %s83_s20  }
  0x36   : > { %p960_p7 = scmp.ne.s32.totalorder %s1224_s18, %s959_s27  ;;  %p961_p12 = pneg %p1587_p8 }
  0x37   : > { %s964_s8 = scalar_lea.hbm %s1569_s2, 2048  ;;  %p965_p2 = scmp.lt.u32.totalorder %s1224_s18, %s1569_s2 }
  0x38   : > { %p962_p13 = pnand %p961_p12, %p960_p7  ;;  %p966_p6 = scmp.lt.u32.totalorder %s964_s8, %s959_s27 }
  0x39   : > { %p968_p10 = scmp.lt.u32.totalorder %s959_s27, %s1224_s18 }
  0x3a   : > { %p963_p4 = pneg %p962_p13  ;;  %p967_p5 = por %p966_p6, %p965_p2 }
  0x3c   : > { %p969_p11 = por %p968_p10, %p967_p5 }
  0x3e   : > { %p970_p1 = pnand %p969_p11, %p963_p4 }
  0x40   : > { %973 = shalt.err (!%p970_p1)
}
  0x41   : > { %s974_s20 = scalar_lea.vmem %s1231_s22, 1024  ;;  %s1078_s6 = smov [#allocation5]  }
  0x42   : > { %p975_p0 = scmp.ne.s32.totalorder %s1231_s22, %s974_s20  ;;  %s979_s11 = sshll.u32 %s1078_s6, 4  ;;  %s980_s11 = int_to_ptr.vmem [resolvable:$false] %s979_s11 }
  0x43   : > { %s981_s19 = scalar_lea.vmem %s980_s11, 2048  ;;  %p982_p7 = scmp.lt.s32.totalorder %s1231_s22, %s980_s11 }
  0x44   : > { %p977_p9 = pnand %p975_p0, %p961_p12  ;;  %p983_p13 = scmp.lt.s32.totalorder %s981_s19, %s974_s20 }
  0x46   : > { %p978_p3 = pneg %p977_p9  ;;  %p984_p2 = por %p983_p13, %p982_p7 }
  0x48   : > { %p985_p6 = pnand %p984_p2, %p978_p3 }
  0x4a   : > { %988 = shalt.err (!%p985_p6)
}
  0x4b   : > { %s1079_s27 = smov 128   ;;  %s1080_s7 = smov 8  }
  0x4c   : > { %804 = dma.hbm_to_vmem [thread:$0]  (!%p1587_p8), %s1224_s18, 1024, %s1231_s22, %s1233_s5, %s1079_s27, %s1079_s27, %s1080_s7  }
  0x4d   : > { %p1588_p12 = scmp.ne.s32.totalorder %s1582_s26, 0 }
  0x4e   : > { %p1589_p4 = scmp.ne.s32.totalorder (!%p1588_p12), %s1577_s21, 0 }
  0x4f   : > { %187 = sbr.rel (%p1588_p12) target bundleno = 483 (0x1e3), region = 32 }
  0x56   : > { %1042 = dma.done.wait (%p1589_p4), [#allocation3], 64  }
  0x57   : > { %1044 = vsyncadd (%p1589_p4), [#allocation3], 4294967232  ;;  %s1268_s9 = sand.u32 1, %s1059_s13   ;;  %p1590_p8 = scmp.ne.s32.totalorder %s1579_s23, 0 }
  0x58   : > { %s771_s8 = sshll.u32 %s1268_s9, 6  ;;  %s194_s10 = scalar_lea.sflag [#allocation6], %s1268_s9 }
  0x59   : > { %s197_s29 = scalar_lea.vmem [#allocation5], %s771_s8 }
  0x5a   : > { %1046 = dma.done.wait (%p1590_p8), %s194_s10, 1024  }
  0x5b   : > { %1048 = vsyncadd (%p1590_p8), %s194_s10, 4294966272  ;;  %v1081_v0 = vmov 0   ;;  %vm257_vm0 = vcmask 130048   ;;  %v1278_v1 = vld [vmem:[%s197_s29 + $0x10] sm:$0xff]  ;;  %v1280_v2 = vld [vmem:[%s197_s29] sm:$0xff]  ;;  %v243_v35 = vlaneseq  ;;  %v1083_v50 = vmov 4  }
  0x5c   : > { %873 = vset.pattern.permute.xlu1 %v1081_v0  ;;  %872 = vset.pattern.permute.xlu0 %v1081_v0  ;;  %v1282_v3 = vld [vmem:[%s197_s29 + $0x18] sm:$0xff]  ;;  %v264_v4 = vsel %vm257_vm0, %v1278_v1, 0.0  ;;  %v258_v5 = vsel %vm257_vm0, %v1280_v2, 0.0  ;;  %v1288_v6 = vld [vmem:[%s197_s29 + $0x8] sm:$0xff]  ;;  %v1296_v10 = vld [vmem:[%s197_s29 + $0x20] sm:$0xff]  ;;  %v290_v18 = vmul.f32 %v1280_v2, %v1280_v2  ;;  %v292_v22 = vmul.f32 %v1278_v1, %v1278_v1  ;;  %s1486_s26 = scalar_lea.vmem [#allocation7], %s771_s8 }
  0x5d   : > { %265 = vadd.xlane.f32.xlu1 %v264_v4  ;;  %259 = vadd.xlane.f32.xlu0 %v258_v5  ;;  %v267_v7 = vsel %vm257_vm0, %v1282_v3, 0.0  ;;  %v261_v8 = vsel %vm257_vm0, %v1288_v6, 0.0  ;;  %v1294_v9 = vld [vmem:[%s197_s29 + $0x28] sm:$0xff]  ;;  %v270_v12 = vsel %vm257_vm0, %v1296_v10, 0.0  ;;  %v1302_v13 = vld [vmem:[%s197_s29 + $0x38] sm:$0xff]  ;;  %v1304_v14 = vld [vmem:[%s197_s29 + $0x30] sm:$0xff]  ;;  %v291_v17 = vmul.f32 %v1288_v6, %v1288_v6 }
  0x5e   : > { %v273_v11 = vsel %vm257_vm0, %v1294_v9, 0.0  ;;  %v279_v15 = vsel %vm257_vm0, %v1302_v13, 0.0  ;;  %v276_v16 = vsel %vm257_vm0, %v1304_v14, 0.0  ;;  %v298_v20 = vsel %vm257_vm0, %v290_v18, 0.0  ;;  %s788_s18 = sshll.u32 %s1067_s15, 10  ;;  %s662_s22 = sshll.u32 %s1486_s26, 4  ;;  %s1513_s22 = int_to_ptr.vmem [resolvable:$true] %s662_s22 }
  0x5f   : > { %v301_v19 = vsel %vm257_vm0, %v291_v17, 0.0  ;;  %v293_v21 = vmul.f32 %v1282_v3, %v1282_v3  ;;  %v304_v24 = vsel %vm257_vm0, %v292_v22, 0.0  ;;  %v295_v25 = vmul.f32 %v1294_v9, %v1294_v9  ;;  %v773_v38 = vld.sshfl [vmem:[#allocation2] sm:$0x33 pattern:$0x75316420]  ;;  %s1511_s20 = scalar_lea.hbm %s1570_s3, %s788_s18 }
  0x60   : > { %v294_v26 = vmul.f32 %v1296_v10, %v1296_v10  ;;  %v297_v29 = vmul.f32 %v1302_v13, %v1302_v13  ;;  %v296_v30 = vmul.f32 %v1304_v14, %v1304_v14  ;;  %v1082_v33 = vmov 1966171168   ;;  %s647_s15 = scalar_lea.sflag [#allocation4], %s1268_s9  ;;  %s989_s6 = scalar_lea.vmem %s1513_s22, 1024 }
  0x61   : > { %268 = vadd.xlane.f32.xlu1 %v267_v7  ;;  %262 = vadd.xlane.f32.xlu0 %v261_v8  ;;  %v307_v23 = vsel %vm257_vm0, %v293_v21, 0.0  ;;  %v313_v27 = vsel %vm257_vm0, %v295_v25, 0.0  ;;  %v241_v34 = vunpack.c.l.s4 %v1082_v33  ;;  %v1334_v37 = vshrl.u32 %v243_v35, 7  ;;  %p990_p5 = scmp.ne.s32.totalorder %s1513_s22, %s989_s6  ;;  %p1591_p10 = scmp.ne.s32.totalorder %s1580_s24, 0 }
  0x62   : > { %v310_v28 = vsel %vm257_vm0, %v294_v26, 0.0  ;;  %v319_v31 = vsel %vm257_vm0, %v297_v29, 0.0  ;;  %v316_v32 = vsel %vm257_vm0, %v296_v30, 0.0  ;;  %v239_v39 = vcombine.high %v773_v38, %v773_v38  ;;  %s1087_s11 = smov [#allocation7]  }
  0x63   : > { %v242_v36 = vunpack.c.0.s8 %v241_v34  ;;  %v1338_v42 = vsub.s32 0, %v1334_v37  ;;  %v1084_v51 = vmov 2   ;;  %v1085_v52 = vmov 1   ;;  %p991_p11 = pnand %p990_p5, %p1591_p10  ;;  %s993_s19 = sshll.u32 %s1087_s11, 4  ;;  %s994_s19 = int_to_ptr.vmem [resolvable:$false] %s993_s19 }
  0x64   : > { %s995_s27 = scalar_lea.vmem %s994_s19, 2048  ;;  %p996_p0 = scmp.lt.s32.totalorder %s1513_s22, %s994_s19 }
  0x65   : > { %274 = vadd.xlane.f32.xlu1 %v273_v11  ;;  %271 = vadd.xlane.f32.xlu0 %v270_v12  ;;  %v245_v40 = vsub.s32 %v242_v36, %v1334_v37  ;;  %p992_p1 = pneg %p991_p11  ;;  %p997_p9 = scmp.lt.s32.totalorder %s995_s27, %s989_s6 }
  0x67   : > { %v253_v41 = vrot.slane %v239_v39, %v245_v40  ;;  %v246_v43 = vrot.slane %v773_v38, %v245_v40  ;;  %p998_p3 = por %p997_p9, %p996_p0 }
  0x69   : > { %280 = vadd.xlane.f32.xlu1 %v279_v15  ;;  %277 = vadd.xlane.f32.xlu0 %v276_v16  ;;  %v1341_v44 = vrot.slane %v253_v41, %v1338_v42  ;;  %v254_v45 = vcombine.high %v246_v43, %v246_v43  ;;  %v255_v47 = vcombine.high %v253_v41, %v253_v41  ;;  %p999_p7 = pnand %p998_p3, %p992_p1 }
  0x6a   : > { %v1348_v48 = vrot.slane %v246_v43, %v1338_v42 }
  0x6b   : > { %v1345_v46 = vrot.slane %v254_v45, %v1338_v42  ;;  %v1352_v49 = vrot.slane %v255_v47, %v1338_v42 }
  0x6d   : > { %302 = vadd.xlane.f32.xlu1 %v301_v19  ;;  %299 = vadd.xlane.f32.xlu0 %v298_v20 }
  0x71   : > { %308 = vadd.xlane.f32.xlu1 %v307_v23  ;;  %305 = vadd.xlane.f32.xlu0 %v304_v24 }
  0x75   : > { %314 = vadd.xlane.f32.xlu1 %v313_v27  ;;  %311 = vadd.xlane.f32.xlu0 %v310_v28 }
  0x79   : > { %320 = vadd.xlane.f32.xlu1 %v319_v31  ;;  %317 = vadd.xlane.f32.xlu0 %v316_v32 }
  0x8a   : > { %403 = vperm.xlu1 %873, %v1341_v44  }
  0x8e   : > { %407 = vperm.xlu1 %873, %v1345_v46  }
  0x8f   : > { %399 = vperm.xlu0 %872, %v1348_v48  }
  0x92   : > { %411 = vperm.xlu1 %873, %v1352_v49  }
  0x93   : > { %874 = vset.pattern.permute.xlu0 %v1083_v50 }
  0x94   : > { %503 = vperm.xlu0 %874, %v1348_v48  }
  0x96   : > { %875 = vset.pattern.permute.xlu1 %v1083_v50 }
  0x97   : > { %507 = vperm.xlu1 %875, %v1341_v44  }
  0x98   : > { %515 = vperm.xlu0 %874, %v1352_v49  }
  0x9b   : > { %511 = vperm.xlu1 %875, %v1345_v46  }
  0x9c   : > { %877 = vset.pattern.permute.xlu0 %v1084_v51 }
  0x9d   : > { %539 = vperm.xlu0 %877, %v1341_v44  }
  0x9f   : > { %876 = vset.pattern.permute.xlu1 %v1084_v51 }
  0xa0   : > { %535 = vperm.xlu1 %876, %v1348_v48  }
  0xa1   : > { %879 = vset.pattern.permute.xlu0 %v1085_v52 }
  0xa4   : > { %543 = vperm.xlu1 %876, %v1345_v46  }
  0xa8   : > { %878 = vset.pattern.permute.xlu1 %v1085_v52 }
  0xea   : > { %v266_v53 = vpop.xlane.xlu1 %265  ;;  %v260_v54 = vpop.xlane.xlu0 %259 }
  0xeb   : > { %v1365_v61 = vmul.f32 0.0625, %v260_v54  ;;  %v1369_v63 = vmul.f32 0.0625, %v266_v53 }
  0xed   : > { %v330_v5 = vmul.f32 %v1365_v61, %v1365_v61  ;;  %v332_v17 = vmul.f32 %v1369_v63, %v1369_v63 }
  0xee   : > { %v269_v55 = vpop.xlane.xlu1 %268  ;;  %v263_v56 = vpop.xlane.xlu0 %262 }
  0xef   : > { %v1367_v62 = vmul.f32 0.0625, %v263_v56  ;;  %v1375_v12 = vmul.f32 0.0625, %v269_v55 }
  0xf1   : > { %v331_v7 = vmul.f32 %v1367_v62, %v1367_v62  ;;  %v333_v25 = vmul.f32 %v1375_v12, %v1375_v12 }
  0xf2   : > { %v275_v57 = vpop.xlane.xlu1 %274  ;;  %v272_v58 = vpop.xlane.xlu0 %271 }
  0xf3   : > { %v1379_v20 = vmul.f32 0.0625, %v275_v57  ;;  %v1385_v28 = vmul.f32 0.0625, %v272_v58 }
  0xf5   : > { %v335_v31 = vmul.f32 %v1379_v20, %v1379_v20  ;;  %v334_v39 = vmul.f32 %v1385_v28, %v1385_v28 }
  0xf6   : > { %v281_v59 = vpop.xlane.xlu1 %280  ;;  %v278_v60 = vpop.xlane.xlu0 %277 }
  0xf7   : > { %v1392_v40 = vmul.f32 0.0625, %v278_v60  ;;  %v1396_v55 = vmul.f32 0.0625, %v281_v59 }
  0xf9   : > { %v336_v56 = vmul.f32 %v1392_v40, %v1392_v40 }
  0xfa   : > { %v303_v0 = vpop.xlane.xlu1 %302  ;;  %v300_v4 = vpop.xlane.xlu0 %299 }
  0xfb   : > { %v323_v8 = vmul.f32 0.0625, %v303_v0  ;;  %v322_v11 = vmul.f32 0.0625, %v300_v4 }
  0xfd   : > { %v339_v15 = vsub.f32 %v323_v8, %v331_v7  ;;  %v338_v16 = vsub.f32 %v322_v11, %v330_v5  ;;  %v337_v5 = vmul.f32 %v1396_v55, %v1396_v55 }
  0xfe   : > { %v309_v18 = vpop.xlane.xlu1 %308  ;;  %v306_v19 = vpop.xlane.xlu0 %305 }
  0xff   : > { %v366_v21 = vmul.f32 %v1348_v48, %v338_v16  ;;  %v325_v22 = vmul.f32 0.0625, %v309_v18  ;;  %v324_v23 = vmul.f32 0.0625, %v306_v19  ;;  %v367_v24 = vmul.f32 %v1348_v48, %v339_v15 }
 0x101   : > { %v374_v26 = vadd.f32 4.0, %v366_v21  ;;  %v340_v27 = vsub.f32 %v324_v23, %v332_v17  ;;  %v341_v32 = vsub.f32 %v325_v22, %v333_v25  ;;  %v375_v34 = vadd.f32 4.0, %v367_v24 }
 0x102   : > { %v315_v29 = vpop.xlane.xlu1 %314  ;;  %v312_v30 = vpop.xlane.xlu0 %311  ;;  %v1086_v22 = vmov 3  }
 0x103   : > { %v327_v33 = vmul.f32 0.0625, %v315_v29  ;;  %883 = vrsqrt.f32 %v374_v26  ;;  %v368_v35 = vmul.f32 %v1341_v44, %v340_v27  ;;  %v326_v36 = vmul.f32 0.0625, %v312_v30 }
 0x104   : > { %v369_v43 = vmul.f32 %v1341_v44, %v341_v32  ;;  %885 = vrsqrt.f32 %v375_v34 }
 0x105   : > { %v343_v38 = vsub.f32 %v327_v33, %v335_v31  ;;  %v376_v47 = vadd.f32 4.0, %v368_v35  ;;  %v342_v50 = vsub.f32 %v326_v36, %v334_v39 }
 0x106   : > { %v318_v41 = vpop.xlane.xlu0 %317  ;;  %v321_v54 = vpop.xlane.xlu1 %320  ;;  %v377_v57 = vadd.f32 4.0, %v369_v43 }
 0x107   : > { %v371_v45 = vmul.f32 %v1345_v46, %v343_v38  ;;  %v328_v52 = vmul.f32 0.0625, %v318_v41  ;;  %v370_v58 = vmul.f32 %v1345_v46, %v342_v50  ;;  %v329_v60 = vmul.f32 0.0625, %v321_v54 }
 0x108   : > { %v391_v41 = vsub.f32 %v1288_v6, %v1367_v62 }
 0x109   : > { %v379_v53 = vadd.f32 4.0, %v371_v45  ;;  %v344_v0 = vsub.f32 %v328_v52, %v336_v56  ;;  %v378_v7 = vadd.f32 4.0, %v370_v58  ;;  %v345_v8 = vsub.f32 %v329_v60, %v337_v5 }
 0x10a   : > { %v404_v26 = vpop.permute.xlu1 %403  ;;  %v393_v60 = vsub.f32 %v1282_v3, %v1375_v12 }
 0x10b   : > { %887 = vrsqrt.f32 %v379_v53  ;;  %v372_v59 = vmul.f32 %v1352_v49, %v344_v0  ;;  %v373_v15 = vmul.f32 %v1352_v49, %v345_v8 }
 0x10c   : > { %889 = vrsqrt.f32 %v376_v47 }
 0x10d   : > { %v884_v4 = vpop.eup %883  ;;  %891 = vrsqrt.f32 %v377_v57  ;;  %v380_v16 = vadd.f32 4.0, %v372_v59  ;;  %v381_v19 = vadd.f32 4.0, %v373_v15 }
 0x10e   : > { %424 = vperm.xlu1 %878, %v884_v4   ;;  %v886_v11 = vpop.eup %885  ;;  %893 = vrsqrt.f32 %v378_v7  ;;  %v400_v31 = vpop.permute.xlu0 %399 }
 0x10f   : > { %895 = vrsqrt.f32 %v380_v16  ;;  %v415_v47 = vmul.f32 %v400_v31, %v391_v41  ;;  %v394_v16 = vsub.f32 %v1296_v10, %v1385_v28  ;;  %v396_v28 = vsub.f32 %v1304_v14, %v1392_v40 }
 0x110   : > { %897 = vrsqrt.f32 %v381_v19 }
 0x112   : > { %429 = vperm.xlu1 %878, %v886_v11  }
 0x113   : > { %v504_v32 = vpop.permute.xlu0 %503 }
 0x115   : > { %v888_v17 = vpop.eup %887 }
 0x116   : > { %v890_v18 = vpop.eup %889  ;;  %449 = vperm.xlu0 %879, %v888_v17  }
 0x117   : > { %434 = vperm.xlu1 %878, %v890_v18   ;;  %v892_v21 = vpop.eup %891  ;;  %v1417_v34 = vpop.permute.xlu0 %515 }
 0x118   : > { %v894_v23 = vpop.eup %893 }
 0x119   : > { %v896_v24 = vpop.eup %895 }
 0x11a   : > { %881 = vset.pattern.permute.xlu0 %v1086_v22  ;;  %v898_v25 = vpop.eup %897 }
 0x11b   : > { %439 = vperm.xlu1 %878, %v892_v21   ;;  %559 = vperm.xlu0 %881, %v1348_v48   ;;  %v408_v48 = vpop.permute.xlu1 %407 }
 0x11c   : > { %v1434_v45 = vpop.permute.xlu0 %539 }
 0x11f   : > { %444 = vperm.xlu1 %878, %v894_v23   ;;  %571 = vperm.xlu0 %881, %v1352_v49   ;;  %v1411_v27 = vpop.permute.xlu1 %411 }
 0x123   : > { %454 = vperm.xlu1 %878, %v896_v24   ;;  %v1413_v29 = vpop.permute.xlu1 %507 }
 0x127   : > { %459 = vperm.xlu1 %878, %v898_v25   ;;  %v1415_v30 = vpop.permute.xlu1 %511  ;;  %v418_v25 = vmul.f32 %v408_v48, %v394_v16 }
 0x12b   : > { %880 = vset.pattern.permute.xlu1 %v1084_v51  ;;  %v536_v33 = vpop.permute.xlu1 %535  ;;  %v390_v51 = vsub.f32 %v1280_v2, %v1365_v61 }
 0x12c   : > { %547 = vperm.xlu1 %880, %v1352_v49   ;;  %v256_v49 = vld [vmem:[%s1568_s1] sm:$0x3] }
 0x12d   : > { %v414_v35 = vmul.f32 %v400_v31, %v390_v51  ;;  %v1428_v36 = vrot.slane %v256_v49, %v1338_v42  ;;  %v392_v42 = vsub.f32 %v1278_v1, %v1369_v63  ;;  %v417_v63 = vmul.f32 %v404_v26, %v393_v60 }
 0x12f   : > { %v416_v56 = vmul.f32 %v404_v26, %v392_v42 }
 0x130   : > { %882 = vset.pattern.permute.xlu1 %v1086_v22 }
 0x131   : > { %563 = vperm.xlu1 %882, %v1341_v44   ;;  %v1422_v44 = vpop.permute.xlu1 %543 }
 0x135   : > { %567 = vperm.xlu1 %882, %v1345_v46   ;;  %v484_v46 = vsub.s32 1, %v1334_v37  ;;  %v395_v37 = vsub.f32 %v1294_v9, %v1379_v20 }
 0x137   : > { %v1430_v39 = vrot.slane %v256_v49, %v484_v46  ;;  %v419_v54 = vmul.f32 %v408_v48, %v395_v37  ;;  %v397_v48 = vsub.f32 %v1302_v13, %v1396_v55 }
 0x18d   : > { %v425_v38 = vpop.permute.xlu1 %424 }
 0x18e   : > { %v462_v43 = vmul.f32 %v425_v38, %v414_v35  ;;  %v420_v38 = vmul.f32 %v1411_v27, %v396_v28 }
 0x190   : > { %v474_v50 = vmul.f32 %v1428_v36, %v462_v43 }
 0x191   : > { %v430_v61 = vpop.permute.xlu1 %429 }
 0x192   : > { %v486_v52 = vadd.f32 %v1430_v39, %v474_v50  ;;  %v463_v53 = vmul.f32 %v430_v61, %v415_v47  ;;  %v421_v50 = vmul.f32 %v1411_v27, %v397_v48 }
 0x194   : > { %v518_v57 = vmul.f32 %v504_v32, %v486_v52  ;;  %v475_v62 = vmul.f32 %v1428_v36, %v463_v53  ;;  %vm494_vm1 = vcmp.ge.f32.partialorder %v486_v52, 0.0 }
 0x195   : > { %v450_v58 = vpop.permute.xlu0 %449 }
 0x196   : > { %v435_v0 = vpop.permute.xlu1 %434  ;;  %v467_v4 = vmul.f32 %v450_v58, %v419_v54  ;;  %v487_v20 = vadd.f32 %v1430_v39, %v475_v62  ;;  %v526_v7 = vsel %vm494_vm1, %v486_v52, %v518_v57 }
 0x197   : > { %v464_v5 = vmul.f32 %v435_v0, %v416_v56  ;;  %v550_v15 = vmul.f32 %v536_v33, %v526_v7 }
 0x198   : > { %v479_v8 = vmul.f32 %v1428_v36, %v467_v4  ;;  %v519_v59 = vmul.f32 %v504_v32, %v487_v20  ;;  %vm495_vm2 = vcmp.ge.f32.partialorder %v487_v20, 0.0 }
 0x199   : > { %v476_v11 = vmul.f32 %v1428_v36, %v464_v5 }
 0x19a   : > { %v1451_v17 = vadd.f32 %v1430_v39, %v479_v8  ;;  %v440_v12 = vpop.permute.xlu1 %439  ;;  %v560_v18 = vpop.permute.xlu0 %559  ;;  %v527_v22 = vsel %vm495_vm2, %v487_v20, %v519_v59 }
 0x19b   : > { %v488_v19 = vadd.f32 %v1430_v39, %v476_v11  ;;  %v465_v21 = vmul.f32 %v440_v12, %v417_v63  ;;  %v574_v23 = vadd.f32 %v560_v18, %v550_v15  ;;  %v551_v24 = vmul.f32 %v536_v33, %v527_v22 }
 0x19c   : > { %vm499_vm6 = vcmp.ge.f32.partialorder %v1451_v17, 0.0 }
 0x19d   : > { %v477_v26 = vmul.f32 %v1428_v36, %v465_v21  ;;  %v774_v31 = vmul.f32 -1.442695, %v574_v23  ;;  %v575_v32 = vadd.f32 %v560_v18, %v551_v24  ;;  %v520_v61 = vmul.f32 %v1413_v29, %v488_v19 }
 0x19e   : > { %v445_v49 = vpop.permute.xlu1 %444  ;;  %vm496_vm3 = vcmp.ge.f32.partialorder %v488_v19, 0.0  ;;  %v572_v60 = vpop.permute.xlu0 %571 }
 0x19f   : > { %v489_v46 = vadd.f32 %v1430_v39, %v477_v26  ;;  %899 = vpow2.f32 %v774_v31  ;;  %v466_v51 = vmul.f32 %v445_v49, %v418_v25  ;;  %v775_v35 = vmul.f32 -1.442695, %v575_v32 }
 0x1a0   : > { %v528_v0 = vsel %vm496_vm3, %v488_v19, %v520_v61 }
 0x1a1   : > { %v478_v41 = vmul.f32 %v1428_v36, %v466_v51  ;;  %901 = vpow2.f32 %v775_v35  ;;  %v521_v53 = vmul.f32 %v1413_v29, %v489_v46  ;;  %vm497_vm5 = vcmp.ge.f32.partialorder %v489_v46, 0.0 }
 0x1a2   : > { %v455_v33 = vpop.permute.xlu1 %454  ;;  %v523_v29 = vmul.f32 %v1415_v30, %v1451_v17  ;;  %v552_v59 = vmul.f32 %v1434_v45, %v528_v0 }
 0x1a3   : > { %v490_v43 = vadd.f32 %v1430_v39, %v478_v41  ;;  %v468_v47 = vmul.f32 %v455_v33, %v420_v38 }
 0x1a5   : > { %v480_v40 = vmul.f32 %v1428_v36, %v468_v47  ;;  %v522_v5 = vmul.f32 %v1415_v30, %v490_v43  ;;  %vm498_vm8 = vcmp.ge.f32.partialorder %v490_v43, 0.0  ;;  %v531_v30 = vsel %vm499_vm6, %v1451_v17, %v523_v29 }
 0x1a6   : > { %v460_v37 = vpop.permute.xlu1 %459  ;;  %v555_v25 = vmul.f32 %v1422_v44, %v531_v30 }
 0x1a7   : > { %v492_v42 = vadd.f32 %v1430_v39, %v480_v40  ;;  %v469_v52 = vmul.f32 %v460_v37, %v421_v50  ;;  %v530_v18 = vsel %vm498_vm8, %v490_v43, %v522_v5 }
 0x1a8   : > { %v554_v24 = vmul.f32 %v1422_v44, %v530_v18 }
 0x1a9   : > { %v900_v54 = vpop.eup %899  ;;  %v481_v56 = vmul.f32 %v1428_v36, %v469_v52  ;;  %vm500_vm4 = vcmp.ge.f32.partialorder %v492_v42, 0.0  ;;  %v524_v55 = vmul.f32 %v1417_v34, %v492_v42  ;;  %v529_v36 = vsel %vm497_vm5, %v489_v46, %v521_v53 }
 0x1aa   : > { %v606_v57 = vadd.f32 1.0, %v900_v54  ;;  %v553_v11 = vmul.f32 %v1434_v45, %v529_v36 }
 0x1ab   : > { %v493_v27 = vadd.f32 %v1430_v39, %v481_v56  ;;  %v548_v62 = vpop.permute.xlu1 %547  ;;  %v532_v58 = vsel %vm500_vm4, %v492_v42, %v524_v55  ;;  %v902_v4 = vpop.eup %901 }
 0x1ac   : > { %903 = vrcp.f32 %v606_v57  ;;  %v556_v20 = vmul.f32 %v548_v62, %v532_v58  ;;  %v607_v7 = vadd.f32 1.0, %v902_v4 }
 0x1ad   : > { %vm501_vm7 = vcmp.ge.f32.partialorder %v493_v27, 0.0  ;;  %v525_v63 = vmul.f32 %v1417_v34, %v493_v27 }
 0x1ae   : > { %v580_v8 = vadd.f32 %v572_v60, %v556_v20  ;;  %905 = vrcp.f32 %v607_v7 }
 0x1af   : > { %v533_v39 = vsel %vm501_vm7, %v493_v27, %v525_v63 }
 0x1b0   : > { %v557_v15 = vmul.f32 %v548_v62, %v533_v39  ;;  %v780_v16 = vmul.f32 -1.442695, %v580_v8  ;;  %v564_v12 = vpop.permute.xlu1 %563 }
 0x1b1   : > { %v576_v19 = vadd.f32 %v564_v12, %v552_v59  ;;  %v577_v21 = vadd.f32 %v564_v12, %v553_v11 }
 0x1b2   : > { %v581_v22 = vadd.f32 %v572_v60, %v557_v15  ;;  %907 = vpow2.f32 %v780_v16 }
 0x1b3   : > { %v776_v34 = vmul.f32 -1.442695, %v576_v19  ;;  %v777_v23 = vmul.f32 -1.442695, %v577_v21 }
 0x1b4   : > { %v781_v45 = vmul.f32 -1.442695, %v581_v22  ;;  %v568_v26 = vpop.permute.xlu1 %567 }
 0x1b5   : > { %909 = vpow2.f32 %v776_v34  ;;  %v578_v31 = vadd.f32 %v568_v26, %v554_v24  ;;  %v579_v32 = vadd.f32 %v568_v26, %v555_v25 }
 0x1b6   : > { %v904_v49 = vpop.eup %903  ;;  %911 = vpow2.f32 %v781_v45 }
 0x1b7   : > { %v630_v17 = vmul.f32 %v904_v49, %v1280_v2  ;;  %913 = vpow2.f32 %v777_v23  ;;  %v778_v28 = vmul.f32 -1.442695, %v578_v31  ;;  %v779_v46 = vmul.f32 -1.442695, %v579_v32 }
 0x1b8   : > { %v906_v51 = vpop.eup %905 }
 0x1b9   : > { %638 = vst.msk [vmem:[%s1486_s26] sm:$0xff] %vm257_vm0, %v630_v17  ;;  %915 = vpow2.f32 %v778_v28  ;;  %v631_v44 = vmul.f32 %v906_v51, %v1288_v6 }
 0x1ba   : > { %917 = vpow2.f32 %v779_v46 }
 0x1bb   : > { %639 = vst.msk [vmem:[%s1486_s26 + $0x8] sm:$0xff] %vm257_vm0, %v631_v44 }
 0x1bc   : > { %v908_v35 = vpop.eup %907 }
 0x1bd   : > { %v612_v38 = vadd.f32 1.0, %v908_v35 }
 0x1bf   : > { %v910_v2 = vpop.eup %909  ;;  %919 = vrcp.f32 %v612_v38 }
 0x1c0   : > { %v912_v41 = vpop.eup %911  ;;  %v608_v33 = vadd.f32 1.0, %v910_v2 }
 0x1c1   : > { %v914_v48 = vpop.eup %913  ;;  %v613_v43 = vadd.f32 1.0, %v912_v41 }
 0x1c2   : > { %v609_v47 = vadd.f32 1.0, %v914_v48  ;;  %921 = vrcp.f32 %v608_v33 }
 0x1c3   : > { %v916_v50 = vpop.eup %915  ;;  %923 = vrcp.f32 %v613_v43 }
 0x1c4   : > { %v918_v40 = vpop.eup %917  ;;  %925 = vrcp.f32 %v609_v47  ;;  %v610_v6 = vadd.f32 1.0, %v916_v50 }
 0x1c5   : > { %v611_v37 = vadd.f32 1.0, %v918_v40 }
 0x1c6   : > { %927 = vrcp.f32 %v610_v6 }
 0x1c7   : > { %929 = vrcp.f32 %v611_v37 }
 0x1c9   : > { %v920_v61 = vpop.eup %919 }
 0x1ca   : > { %v636_v42 = vmul.f32 %v920_v61, %v1304_v14 }
 0x1cc   : > { %v922_v52 = vpop.eup %921  ;;  %644 = vst.msk [vmem:[%s1486_s26 + $0x30] sm:$0xff] %vm257_vm0, %v636_v42 }
 0x1cd   : > { %v924_v53 = vpop.eup %923  ;;  %v632_v54 = vmul.f32 %v922_v52, %v1278_v1 }
 0x1ce   : > { %v926_v56 = vpop.eup %925  ;;  %v637_v55 = vmul.f32 %v924_v53, %v1302_v13 }
 0x1cf   : > { %v633_v57 = vmul.f32 %v926_v56, %v1282_v3  ;;  %640 = vst.msk [vmem:[%s1486_s26 + $0x10] sm:$0xff] %vm257_vm0, %v632_v54 }
 0x1d0   : > { %v928_v14 = vpop.eup %927  ;;  %645 = vst.msk [vmem:[%s1486_s26 + $0x38] sm:$0xff] %vm257_vm0, %v637_v55 }
 0x1d1   : > { %v930_v27 = vpop.eup %929  ;;  %641 = vst.msk [vmem:[%s1486_s26 + $0x18] sm:$0xff] %vm257_vm0, %v633_v57  ;;  %v634_v1 = vmul.f32 %v928_v14, %v1296_v10 }
 0x1d2   : > { %v635_v3 = vmul.f32 %v930_v27, %v1294_v9 }
 0x1d3   : > { %642 = vst.msk [vmem:[%s1486_s26 + $0x20] sm:$0xff] %vm257_vm0, %v634_v1 }
 0x1d4   : > { %643 = vst.msk [vmem:[%s1486_s26 + $0x28] sm:$0xff] %vm257_vm0, %v635_v3 }
 0x1d5   : > { %1002 = shalt.err (!%p999_p7)
}
 0x1d6   : > { %s1003_s7 = scalar_lea.hbm %s1511_s20, 1024  ;;  %s1007_s29 = scalar_lea.hbm %s1570_s3, 2048 }
 0x1d7   : > { %p1004_p13 = scmp.ne.s32.totalorder %s1511_s20, %s1003_s7  ;;  %p1008_p12 = scmp.lt.u32.totalorder %s1511_s20, %s1570_s3 }
 0x1d8   : > { %p1009_p4 = scmp.lt.u32.totalorder %s1007_s29, %s1003_s7  ;;  %p1011_p5 = scmp.lt.u32.totalorder %s1003_s7, %s1511_s20 }
 0x1d9   : > { %p1005_p2 = pnand %p1004_p13, %p1591_p10 }
 0x1da   : > { %p1010_p8 = por %p1009_p4, %p1008_p12 }
 0x1db   : > { %p1006_p6 = pneg %p1005_p2 }
 0x1dc   : > { %p1012_p11 = por %p1011_p5, %p1010_p8 }
 0x1de   : > { %p1013_p1 = pnand %p1012_p11, %p1006_p6 }
 0x1e0   : > { %1016 = shalt.err (!%p1013_p1)
}
 0x1e1   : > { %s1088_s26 = smov 128   ;;  %s1089_s18 = smov 8  }
 0x1e2   : > { %795 = dma.vmem_to_hbm [thread:$0]  (%p1591_p10), %s1513_s22, 1024, %s1511_s20, %s647_s15, %s1088_s26, %s1088_s26, %s1089_s18  }
 0x1e3 PF: > { %s677_s5 = sand.u32 1, %s1055_s12   ;;  %p1592_p0 = scmp.ne.s32.totalorder %s1581_s25, 0 }
 0x1e4   : > { %p1593_p9 = scmp.ge.s32.totalorder %s1075_s17, 2  ;;  %s678_s30 = scalar_lea.sflag [#allocation4], %s677_s5 }
 0x1e6   : > { %p806_p3 = pnand %p1593_p9, %p1592_p0 }
 0x1e8   : > { %1050 = dma.done.wait (!%p806_p3), %s678_s30, 1024  }
 0x1e9   : > { %1052 = vsyncadd (!%p806_p3), %s678_s30, 4294966272  ;;  %s20_s17 = sadd.s32 1, %s1075_s17   ;;  %s1594_s12 = smov %s1059_s13 }
 0x1ea   : > { %p17_p7 = scmp.ge.s32.totalorder %s20_s17, 4   ;;  %s1595_s13 = smov %s1063_s14 }
 0x1eb   : > { %s1596_s14 = smov %s1229_s28  ;;  %s1597_s15 = smov %s1071_s16 }
 0x1ec   : > { %s1598_s16 = smov %s1600_s4  ;;  %19 = sbr.rel (!%p17_p7) target bundleno = 7 (0x7), region = 82 }
 0x1f3   :  { %683 = vsyncpa [#allocation3], 1 }
 0x1f4   :  { %685 = vsyncpa [#allocation3 + $0x1], 1 }
 0x1f5   :  { %686 = vsyncpa [#allocation6], 1 }
 0x1f6   :  { %688 = vsyncpa [#allocation6 + $0x1], 1 }
 0x1f7   :  { %689 = vsyncpa [#allocation4], 1 }
 0x1f8   :  { %691 = vsyncpa [#allocation4 + $0x1], 1 }

</bundles_post_ra>
